<compile_context>
chip_gen: v7x
topology: tpu7x:2x2x1
jax: 0.10.0
libtpu: 0.0.40
codegen_flags: <defaults>
</compile_context>

<pallas_src>
import functools

import jax
import jax.numpy as jnp
from jax.experimental import pallas as pl
from jax.experimental.pallas import tpu as pltpu


def _round_up(n: int, m: int) -> int:
    return ((n + m - 1) // m) * m


def _mlp_kernel(x_ref, w1_ref, b1_ref, w2_ref, b2_ref, w3_ref, b3_ref, o_ref,
                *, compute_dtype, approx_sigmoid):
    # x_ref: (F, TILE_B) in compute_dtype — feature-major, batch on the lane axis.
    x = x_ref[...]

    # Layer 1: (L1, F) @ (F, TILE_B) -> (L1, TILE_B).  bf16 operands, f32 acc.
    h1 = jnp.dot(w1_ref[...], x, preferred_element_type=jnp.float32)
    h1 = jnp.maximum(h1 + b1_ref[...], 0.0)          # lane-dense VPU bias + ReLU

    # Layer 2: (L2, L1) @ (L1, TILE_B) -> (L2, TILE_B).
    h2 = jnp.dot(w2_ref[...], h1.astype(compute_dtype),
                 preferred_element_type=jnp.float32)
    h2 = jnp.maximum(h2 + b2_ref[...], 0.0)

    # Layer 3 (L2 -> 1) off the MXU: VPU multiply + sublane (XLU) reduce gives a
    # lane-dense (1, TILE_B) row directly (batch stays on the lane axis).
    z = jnp.sum(h2 * w3_ref[...], axis=0, keepdims=True) + b3_ref[...]

    # Sigmoid epilogue: exp + reciprocal ride the EUP slot (VALU stays clear).
    o_ref[...] = pl.reciprocal(1.0 + jnp.exp(-z), approx=approx_sigmoid)


def sequential_nn_forward(x, params, *, tile_b=8192,
                          compute_dtype=jnp.bfloat16,
                          approx_sigmoid=True,
                          x_feature_major=False):
    """Fused MLP forward as a pipelined Pallas TPU kernel.

    Args:
      x: (B, 10) float input (or (10, B) if `x_feature_major=True`).
      params: (w1 (L1,10), b1 (L1,1), w2 (L2,L1), b2 (L2,1), w3 (L2,1), b3 (1,1))
        — PyTorch (out, in) weight layout; the 16->1 weight is stored as a column.
      tile_b: batch-tile size (rounded to a multiple of 128 when B > tile_b).
      compute_dtype: dtype fed to the two MXU dots (bf16 recommended);
        accumulation / bias / ReLU / sigmoid always stay f32.
      approx_sigmoid: use the EUP approximate reciprocal in the epilogue.
    """
    w1, b1, w2, b2, w3, b3 = params
    L1, F = w1.shape
    L2 = w2.shape[0]

    # Feature-major presentation of x: (F, B), batch on the lane axis.  The
    # transpose is a one-time wrapper op; at production scale prefer handing in
    # a feature-major x directly (x_feature_major=True) to avoid the extra pass.
    x_t = x if x_feature_major else x.T
    x_t = x_t.astype(compute_dtype)
    f_dim, B = x_t.shape
    assert f_dim == F, f"feature dim mismatch: x has {f_dim}, w1 expects {F}"

    # Weights for the MXU dots cast once; everything used on the VPU stays f32.
    w1c = w1.astype(compute_dtype)
    w2c = w2.astype(compute_dtype)
    b1f = b1.astype(jnp.float32)
    b2f = b2.astype(jnp.float32)
    w3f = w3.astype(jnp.float32)
    b3f = b3.astype(jnp.float32)

    # Tile sizing: lane-dense (multiple-of-128) output blocks; single
    # full-array block when the whole batch fits in one tile.
    tile_b = int(tile_b)
    if B <= tile_b:
        tile = B
        num_tiles = 1
    else:
        tile = _round_up(tile_b, 128)
        num_tiles = pl.cdiv(B, tile)
    padded_b = num_tiles * tile          # output allocation only; x is NOT padded

    flops = 2 * B * (F * L1 + L1 * L2 + L2)
    bytes_accessed = (
        int(x_t.size) * x_t.dtype.itemsize
        + sum(int(a.size) * a.dtype.itemsize for a in (w1c, b1f, w2c, b2f, w3f, b3f))
        + padded_b * 4)
    cost = pl.CostEstimate(flops=flops, transcendentals=B,
                           bytes_accessed=bytes_accessed)

    def full_block(a):
        # Whole (tiny) array as one block with a constant index_map: DMA'd once,
        # stays VMEM-resident across all grid steps.
        return pl.BlockSpec(a.shape, lambda i: (0,) * a.ndim)

    kernel = functools.partial(_mlp_kernel,
                               compute_dtype=compute_dtype,
                               approx_sigmoid=approx_sigmoid)

    out = pl.pallas_call(
        kernel,
        out_shape=jax.ShapeDtypeStruct((1, padded_b), jnp.float32),
        grid=(num_tiles,),
        in_specs=[
            pl.BlockSpec((F, tile), lambda i: (0, i)),   # x streamed per batch tile
            full_block(w1c), full_block(b1f),
            full_block(w2c), full_block(b2f),
            full_block(w3f), full_block(b3f),
        ],
        out_specs=pl.BlockSpec((1, tile), lambda i: (0, i)),
        compiler_params=pltpu.CompilerParams(
            dimension_semantics=("parallel",),           # v7x megacore sharding
        ),
        cost_estimate=cost,
    )(x_t, w1c, b1f, w2c, b2f, w3f, b3f)

    return out[0, :B].reshape(B, 1)


def init_params(key, layer_size_1=16, layer_size_2=16):
    """Deterministic init matching the PyTorch module's shapes.

    Weights kept in PyTorch (out, in) layout for the first two layers (the
    kernel computes W @ x_fm); the last layer's weight is stored as a column
    (L2, 1) so the kernel can apply it as a VPU multiply + sublane reduce.
    """
    k1, k2, k3, k4, k5, k6 = jax.random.split(key, 6)

    def uniform_init(k, shape, fan_in):
        bound = 1.0 / jnp.sqrt(jnp.float32(fan_in))
        return jax.random.uniform(k, shape, jnp.float32, -bound, bound)

    w1 = uniform_init(k1, (layer_size_1, 10), 10)              # (out, in)
    b1 = uniform_init(k2, (layer_size_1, 1), 10)
    w2 = uniform_init(k3, (layer_size_2, layer_size_1), layer_size_1)
    b2 = uniform_init(k4, (layer_size_2, 1), layer_size_1)
    w3 = uniform_init(k5, (layer_size_2, 1), layer_size_2)     # W3^T column
    b3 = uniform_init(k6, (1, 1), layer_size_2)
    return (w1, b1, w2, b2, w3, b3)


def reference_forward(x, params):
    """Pure-JAX reference for correctness checking (batch-major math)."""
    w1, b1, w2, b2, w3, b3 = params
    h1 = jnp.maximum(x @ w1.T + b1.T, 0.0)
    h2 = jnp.maximum(h1 @ w2.T + b2.T, 0.0)
    return jax.nn.sigmoid(h2 @ w3 + b3)


if __name__ == "__main__":
    key = jax.random.PRNGKey(0)
    k_params, k_x = jax.random.split(key)

    params = init_params(k_params, layer_size_1=16, layer_size_2=16)
    x = jax.random.normal(k_x, (8, 10), dtype=jnp.float32)   # (batch=8, features=10)

    ref = reference_forward(x, params)

    # Exact f32 path: verifies the kernel math bit-for-bit-ish vs the reference.
    out_f32 = jax.block_until_ready(
        sequential_nn_forward(x, params,
                              compute_dtype=jnp.float32,
                              approx_sigmoid=False))
    assert out_f32.shape == (8, 1)
    assert jnp.allclose(out_f32, ref, atol=1e-4, rtol=1e-4)

    # Default fast path: bf16 MXU operands + approx sigmoid (accumulation f32).
    out_fast = jax.block_until_ready(sequential_nn_forward(x, params))
    assert out_fast.shape == (8, 1)
    assert jnp.allclose(out_fast, ref, atol=2e-2, rtol=2e-2)

    print("KERNEL_OK")
</pallas_src>

<mosaic_0001>
module attributes {stable_mosaic.version = 11 : i64} {
  func.func @_mlp_kernel(%arg0: i32, %arg1: memref<10x8xf32, #tpu.memory_space<vmem>>, %arg2: memref<16x10xf32, #tpu.memory_space<vmem>>, %arg3: memref<16x1xf32, #tpu.memory_space<vmem>>, %arg4: memref<16x16xf32, #tpu.memory_space<vmem>>, %arg5: memref<16x1xf32, #tpu.memory_space<vmem>>, %arg6: memref<16x1xf32, #tpu.memory_space<vmem>>, %arg7: memref<1x1xf32, #tpu.memory_space<vmem>>, %arg8: memref<1x8xf32, #tpu.memory_space<vmem>>) attributes {dimension_semantics = [#tpu.dimension_semantics<parallel>], iteration_bounds = array<i64: 1>, scalar_prefetch = 0 : i64, scratch_operands = 0 : i64, tpu.core_type = #tpu.core_type<tc>, window_params = [{transform_indices = @transform_0, window_bounds = array<i64: 10, 8>}, {pipeline_mode = #tpu.pipeline_mode<synchronous>, transform_indices = @transform_1, window_bounds = array<i64: 16, 10>}, {pipeline_mode = #tpu.pipeline_mode<synchronous>, transform_indices = @transform_2, window_bounds = array<i64: 16, 1>}, {pipeline_mode = #tpu.pipeline_mode<synchronous>, transform_indices = @transform_3, window_bounds = array<i64: 16, 16>}, {pipeline_mode = #tpu.pipeline_mode<synchronous>, transform_indices = @transform_4, window_bounds = array<i64: 16, 1>}, {pipeline_mode = #tpu.pipeline_mode<synchronous>, transform_indices = @transform_5, window_bounds = array<i64: 16, 1>}, {pipeline_mode = #tpu.pipeline_mode<synchronous>, transform_indices = @transform_6, window_bounds = array<i64: 1, 1>}, {transform_indices = @transform_7, window_bounds = array<i64: 1, 8>}]} {
    %c0 = arith.constant 0 : index
    %c0_0 = arith.constant 0 : index
    %0 = vector.load %arg1[%c0, %c0_0] : memref<10x8xf32, #tpu.memory_space<vmem>>, vector<10x8xf32>
    %c0_1 = arith.constant 0 : index
    %c0_2 = arith.constant 0 : index
    %1 = vector.load %arg2[%c0_1, %c0_2] : memref<16x10xf32, #tpu.memory_space<vmem>>, vector<16x10xf32>
    %cst = arith.constant dense<0.000000e+00> : vector<16x8xf32>
    %2 = tpu.matmul %1, %0, %cst {dimension_numbers = #tpu.dot_dimension_numbers<[1], [0], [0], [1], [0, 0, 1, 1], [], []>} : vector<16x10xf32>, vector<10x8xf32>, vector<16x8xf32> -> vector<16x8xf32>
    %c0_3 = arith.constant 0 : index
    %c0_4 = arith.constant 0 : index
    %3 = vector.load %arg3[%c0_3, %c0_4] : memref<16x1xf32, #tpu.memory_space<vmem>>, vector<16x1xf32>
    %4 = vector.broadcast %3 : vector<16x1xf32> to vector<16x8xf32>
    %5 = arith.addf %2, %4 : vector<16x8xf32>
    %cst_5 = arith.constant 0.000000e+00 : f32
    %6 = vector.broadcast %cst_5 : f32 to vector<16x8xf32>
    %7 = arith.maximumf %5, %6 : vector<16x8xf32>
    %c0_6 = arith.constant 0 : index
    %c0_7 = arith.constant 0 : index
    %8 = vector.load %arg4[%c0_6, %c0_7] : memref<16x16xf32, #tpu.memory_space<vmem>>, vector<16x16xf32>
    %cst_8 = arith.constant dense<0.000000e+00> : vector<16x8xf32>
    %9 = tpu.matmul %8, %7, %cst_8 {dimension_numbers = #tpu.dot_dimension_numbers<[1], [0], [0], [1], [0, 0, 1, 1], [], []>} : vector<16x16xf32>, vector<16x8xf32>, vector<16x8xf32> -> vector<16x8xf32>
    %c0_9 = arith.constant 0 : index
    %c0_10 = arith.constant 0 : index
    %10 = vector.load %arg5[%c0_9, %c0_10] : memref<16x1xf32, #tpu.memory_space<vmem>>, vector<16x1xf32>
    %11 = vector.broadcast %10 : vector<16x1xf32> to vector<16x8xf32>
    %12 = arith.addf %9, %11 : vector<16x8xf32>
    %cst_11 = arith.constant 0.000000e+00 : f32
    %13 = vector.broadcast %cst_11 : f32 to vector<16x8xf32>
    %14 = arith.maximumf %12, %13 : vector<16x8xf32>
    %c0_12 = arith.constant 0 : index
    %c0_13 = arith.constant 0 : index
    %15 = vector.load %arg6[%c0_12, %c0_13] : memref<16x1xf32, #tpu.memory_space<vmem>>, vector<16x1xf32>
    %16 = vector.broadcast %15 : vector<16x1xf32> to vector<16x8xf32>
    %17 = arith.mulf %14, %16 : vector<16x8xf32>
    %cst_14 = arith.constant dense<0.000000e+00> : vector<8xf32>
    %18 = vector.multi_reduction <add>, %17, %cst_14 [0] : vector<16x8xf32> to vector<8xf32>
    %19 = vector.shape_cast %18 : vector<8xf32> to vector<1x8xf32>
    %c0_15 = arith.constant 0 : index
    %c0_16 = arith.constant 0 : index
    %20 = vector.load %arg7[%c0_15, %c0_16] : memref<1x1xf32, #tpu.memory_space<vmem>>, vector<1x1xf32>
    %21 = vector.broadcast %20 : vector<1x1xf32> to vector<1x8xf32>
    %22 = arith.addf %19, %21 : vector<1x8xf32>
    %cst_17 = arith.constant 0.000000e+00 : f32
    %23 = vector.broadcast %cst_17 : f32 to vector<1x8xf32>
    %24 = arith.subf %23, %22 : vector<1x8xf32>
    %25 = math.exp %24 : vector<1x8xf32>
    %cst_18 = arith.constant 1.000000e+00 : f32
    %26 = vector.broadcast %cst_18 : f32 to vector<1x8xf32>
    %27 = arith.addf %26, %25 : vector<1x8xf32>
    %28 = tpu.reciprocal %27 : vector<1x8xf32> -> vector<1x8xf32>
    %c0_19 = arith.constant 0 : index
    %c0_20 = arith.constant 0 : index
    %29 = vector.load %arg8[%c0_19, %c0_20] : memref<1x8xf32, #tpu.memory_space<vmem>>, vector<1x8xf32>
    tpu.vector_store %arg8[%c0_19, %c0_20], %28 {strides = array<i32>} : memref<1x8xf32, #tpu.memory_space<vmem>>, vector<1x8xf32>,
    return
  }
  func.func @transform_0(%arg0: i32) -> (i32, i32) {
    %c0_i32 = arith.constant 0 : i32
    %c0_i32_0 = arith.constant 0 : i32
    return %c0_i32, %arg0 : i32, i32
  }
  func.func @transform_1(%arg0: i32) -> (i32, i32) {
    %c0_i32 = arith.constant 0 : i32
    %c0_i32_0 = arith.constant 0 : i32
    %c0_i32_1 = arith.constant 0 : i32
    return %c0_i32, %c0_i32_0 : i32, i32
  }
  func.func @transform_2(%arg0: i32) -> (i32, i32) {
    %c0_i32 = arith.constant 0 : i32
    %c0_i32_0 = arith.constant 0 : i32
    %c0_i32_1 = arith.constant 0 : i32
    return %c0_i32, %c0_i32_0 : i32, i32
  }
  func.func @transform_3(%arg0: i32) -> (i32, i32) {
    %c0_i32 = arith.constant 0 : i32
    %c0_i32_0 = arith.constant 0 : i32
    %c0_i32_1 = arith.constant 0 : i32
    return %c0_i32, %c0_i32_0 : i32, i32
  }
  func.func @transform_4(%arg0: i32) -> (i32, i32) {
    %c0_i32 = arith.constant 0 : i32
    %c0_i32_0 = arith.constant 0 : i32
    %c0_i32_1 = arith.constant 0 : i32
    return %c0_i32, %c0_i32_0 : i32, i32
  }
  func.func @transform_5(%arg0: i32) -> (i32, i32) {
    %c0_i32 = arith.constant 0 : i32
    %c0_i32_0 = arith.constant 0 : i32
    %c0_i32_1 = arith.constant 0 : i32
    return %c0_i32, %c0_i32_0 : i32, i32
  }
  func.func @transform_6(%arg0: i32) -> (i32, i32) {
    %c0_i32 = arith.constant 0 : i32
    %c0_i32_0 = arith.constant 0 : i32
    %c0_i32_1 = arith.constant 0 : i32
    return %c0_i32, %c0_i32_0 : i32, i32
  }
  func.func @transform_7(%arg0: i32) -> (i32, i32) {
    %c0_i32 = arith.constant 0 : i32
    %c0_i32_0 = arith.constant 0 : i32
    return %c0_i32, %arg0 : i32, i32
  }
}

</mosaic_0001>

<bundles_post_ra>
// kernel: tpu_custom_call.1
= control target key start
LH: loop header
LB: loop body
LE: loop exit
PB: predicated region body
PF: predicated region fallthrough
CT: control target
= control target key end

     0   :  { %s453_s0 = inlined_call_operand.vmem [shape: f32[10,8], index: 0, kind: input, shape index: {}]   ;;  %s454_s1 = inlined_call_operand.vmem [shape: f32[16,10], index: 1, kind: input, shape index: {}]   ;;  %s455_s2 = inlined_call_operand.vmem [shape: f32[16,1], index: 2, kind: input, shape index: {}]   ;;  %s456_s3 = inlined_call_operand.vmem [shape: f32[16,16], index: 3, kind: input, shape index: {}]   ;;  %s457_s4 = inlined_call_operand.vmem [shape: f32[16,1], index: 4, kind: input, shape index: {}]   ;;  %s458_s5 = inlined_call_operand.vmem [shape: f32[16,1], index: 5, kind: input, shape index: {}]   ;;  %s459_s6 = inlined_call_operand.<no memory space> [shape: f32[1,1], index: 6, kind: input, shape index: {}]   ;;  %s460_s7 = inlined_call_operand.hbm [shape: f32[1,8], index: 7, kind: output, shape index: {}]  }
   0x1   :  { %v12_v0 = vstv %s459_s6 }
   0x2   :  { %13 = vst [vmem:[#allocation2] sm:$0x1] %v12_v0 }
   0x3   :  { %v29_v1 = vld [vmem:[%s453_s0] sm:$0xff]  ;;  %v30_v2 = vld [vmem:[%s453_s0 + $0x8] sm:$0x3]  ;;  %vm52_vm0 = vcmask 1041408   ;;  %vm357_vm1 = vmmov 1   ;;  %vm45_vm3 = vcmask 80896  }
   0x4   :  { %v31_v3 = vld [vmem:[%s454_s1] sm:$0xff]  ;;  %v314_v4 = vpack.c.bf16 %v30_v2, %v29_v1  ;;  %vm315_vm2 = vmpackc.low %vm52_vm0, %vm357_vm1  ;;  %v358_v6 = vmov 0  }
   0x5   :  { %v33_v5 = vld [vmem:[%s455_s2] sm:$0xff]  ;;  %304 = vmatprep.mubr.msk.f32.mxu0 %vm45_vm3, %v31_v3  ;;  %327 = vset.pattern.permute.xlu0 %v358_v6 }
   0x6   :  { %316 = vmatprep.subr.msk.bf16.mxu0 %vm315_vm2, %v314_v4  ;;  %37 = vperm.xlu0 %327, %v33_v5  }
   0x7   :  { %14 = vsyncpa [#allocation4], 0  ;;  %319 = vmatpush3.bf16.msk.msra.mxu0 %vm315_vm2, %v314_v4  ;;  %v32_v7 = vld [vmem:[%s454_s1 + $0x8] sm:$0xff]  ;;  %328 = vset.pattern.permute.xlu1 %v358_v6  ;;  %v231_v9 = vld [vmem:[%s458_s5] sm:$0xff]  ;;  %vm147_vm4 = vcmask 130048   ;;  %vm245_vm5 = vcmask 64512   ;;  %v261_v39 = vlaneseq }
   0x8   :  { %v34_v8 = vld [vmem:[%s455_s2 + $0x8] sm:$0xff]  ;;  %v133_v11 = vld [vmem:[%s456_s3] sm:$0xff]  ;;  %vm271_vm6 = vcmask 57344  }
   0x9   :  { %v255_v10 = vld [vmem:[#allocation2] sm:$0x1]  ;;  %311 = vmatprep.mubr.msk.f32.mxu1 %vm147_vm4, %v133_v11  ;;  %v136_v13 = vld [vmem:[%s457_s4 + $0x8] sm:$0xff]  ;;  %v262_v42 = vshrl.u32 %v261_v39, 7 }
   0xa   :  { %305 = vmatmul.mubr.msk.f32.vlgmr.msra.gmra.mrb[0].mxu0 %vm45_vm3, %v32_v7  ;;  %42 = vperm.xlu0 %327, %v34_v8   ;;  %v135_v12 = vld [vmem:[%s457_s4] sm:$0xff]  ;;  %v232_v14 = vld [vmem:[%s458_s5 + $0x8] sm:$0xff] }
   0xb   :  { %139 = vperm.xlu1 %328, %v135_v12   ;;  %v134_v24 = vld [vmem:[%s456_s3 + $0x8] sm:$0xff]  ;;  %v263_v45 = vsub.s32 0, %v262_v42  ;;  %s359_s3 = smov [#allocation3]  }
   0xc   :  { %s279_s4 = sshll.u32 %s359_s3, 4  ;;  %s280_s4 = int_to_ptr.vmem [resolvable:$true] %s279_s4 }
   0xd   :  { %s333_s5 = scalar_lea.vmem %s280_s4, 16  ;;  %s337_s23 = scalar_lea.vmem %s280_s4, 32 }
   0xe   :  { %235 = vperm.xlu0 %327, %v231_v9   ;;  %p334_p0 = scmp.ne.s32.totalorder %s280_s4, %s333_s5  ;;  %p338_p1 = scmp.lt.s32.totalorder %s280_s4, %s280_s4 }
   0xf   :  { %144 = vperm.xlu1 %328, %v136_v13   ;;  %p339_p2 = scmp.lt.s32.totalorder %s337_s23, %s333_s5 }
  0x11   :  { %p340_p3 = por %p339_p2, %p338_p1 }
  0x12   :  { %258 = vperm.xlu0 %327, %v255_v10  }
  0x13   :  { %240 = vperm.xlu1 %328, %v232_v14   ;;  %p341_p4 = pnand %p340_p3, %p334_p0 }
  0x85   :  { %v38_v15 = vpop.permute.xlu0 %37 }
  0x89   :  { %v43_v16 = vpop.permute.xlu0 %42 }
  0x8a   :  { %v140_v25 = vpop.permute.xlu1 %139 }
  0x8d   :  { %v236_v34 = vpop.permute.xlu0 %235 }
  0x8e   :  { %v145_v26 = vpop.permute.xlu1 %144 }
  0x91   :  { %v259_v47 = vpop.permute.xlu0 %258 }
  0x92   :  { %v241_v32 = vpop.permute.xlu1 %240  ;;  %v264_v49 = vrot.slane %v259_v47, %v263_v45 }
  0xdd   :  { %v306_v17 = vpop.f32.mrb[0].mxu0 }
  0xde   :  { %v128_v18 = vadd.f32 %v306_v17, %v43_v16  ;;  %v122_v19 = vpop.f32.mrb[1].mxu0 }
  0xdf   :  { %v123_v20 = vadd.f32 %v122_v19, %v38_v15 }
  0xe0   :  { %v132_v21 = vmax.f32 %v128_v18, 0.0 }
  0xe1   :  { %v131_v22 = vmax.f32 %v123_v20, 0.0 }
  0xe3   :  { %v320_v23 = vpack.c.bf16 %v132_v21, %v131_v22 }
  0xe5   :  { %321 = vmatprep.subr.bf16.mxu1 %v320_v23 }
  0xe6   :  { %323 = vmatpush3.bf16.msra.mxu1 %v320_v23 }
  0xe9   :  { %312 = vmatmul.mubr.msk.f32.vlgmr.msra.gmra.mrb[0].mxu1 %vm147_vm4, %v134_v24 }
 0x1bc   :  { %v313_v27 = vpop.f32.mrb[0].mxu1 }
 0x1bd   :  { %v226_v28 = vadd.f32 %v313_v27, %v145_v26  ;;  %v220_v29 = vpop.f32.mrb[1].mxu1 }
 0x1be   :  { %v221_v30 = vadd.f32 %v220_v29, %v140_v25 }
 0x1bf   :  { %v230_v31 = vmax.f32 %v226_v28, 0.0 }
 0x1c0   :  { %v229_v33 = vmax.f32 %v221_v30, 0.0 }
 0x1c1   :  { %v244_v35 = vmul.f32 %v241_v32, %v230_v31 }
 0x1c2   :  { %v243_v36 = vmul.f32 %v236_v34, %v229_v33 }
 0x1c3   :  { %v247_v37 = vsel %vm245_vm5, %v244_v35, 0.0 }
 0x1c4   :  { %v246_v38 = vsel %vm245_vm5, %v243_v36, 0.0 }
 0x1c5   :  { %v248_v40 = vadd.f32 %v247_v37, %v246_v38 }
 0x1c7   :  { %v249_v41 = vrot.slane %v248_v40, 4 }
 0x1c9   :  { %v250_v43 = vadd.f32 %v249_v41, %v248_v40 }
 0x1cb   :  { %v251_v44 = vrot.slane %v250_v43, 2 }
 0x1cd   :  { %v252_v46 = vadd.f32 %v251_v44, %v250_v43 }
 0x1cf   :  { %v253_v48 = vrot.slane %v252_v46, 1 }
 0x1d1   :  { %v254_v50 = vadd.f32 %v253_v48, %v252_v46 }
 0x1d3   :  { %v265_v51 = vadd.f32 %v264_v49, %v254_v50 }
 0x1d5   :  { %v266_v52 = vsub.f32 0.0, %v265_v51 }
 0x1d7   :  { %v267_v53 = vmul.f32 1.442695, %v266_v52 }
 0x1d9   :  { %329 = vpow2.f32 %v267_v53 }
 0x1e3   :  { %v330_v54 = vpop.eup %329 }
 0x1e4   :  { %v269_v55 = vadd.f32 1.0, %v330_v54 }
 0x1e6   :  { %331 = vrcp.f32 %v269_v55 }
 0x1f0   :  { %v332_v56 = vpop.eup %331 }
 0x1f1   :  { %272 = vst.msk [vmem:[#allocation3] sm:$0x1] %vm271_vm6, %v332_v56 }
 0x1f2   :  { %344 = shalt.err (!%p341_p4)
}
 0x1f3   :  { %s345_s26 = scalar_lea.hbm %s460_s7, 16 }
 0x1f4   :  { %p346_p5 = scmp.ne.s32.totalorder %s460_s7, %s345_s26  ;;  %p349_p6 = scmp.lt.u32.totalorder %s345_s26, %s460_s7 }
 0x1f6   :  { %p351_p7 = pnand %p349_p6, %p346_p5 }
 0x1f8   :  { %354 = shalt.err (!%p351_p7)
}
 0x1f9   :  { %282 = dma.vmem_to_hbm [thread:$0]  %s280_s4, 16, %s460_s7, [#allocation4]  }
 0x1fa   :  { %355 = dma.done.wait [#allocation4], 16  }
 0x1fb   :  { %356 = vsyncadd [#allocation4], 4294967280 }
 0x1fc   :  { %286 = vsyncpa [#allocation4], 1 }

</bundles_post_ra>
